<compile_context>
chip_gen: v6e
topology: v6e:2x2x1
jax: 0.10.0
libtpu: 0.0.40
codegen_flags: <defaults>
</compile_context>

<pallas_src>
import functools

import jax
import jax.numpy as jnp
from jax.experimental import pallas as pl
from jax.experimental.pallas import tpu as pltpu


def _round_up(x, m):
    return (x + m - 1) // m * m


def _fc_ln_relu_cm_kernel(x_ref, w_ref, p_ref, o_ref, *, n_valid, eps, need_mask):
    """Channel-major fused Linear + LayerNorm + ReLU for one (batch, T-tile).

    x_ref: (Din, Tt)       matmul dtype (f32 or bf16)
    w_ref: (Dout_pad, Din) matmul dtype (torch Linear layout, zero-padded rows)
    p_ref: (Dout_pad, 4)   f32 — columns: [bias | gamma | beta | row-mask]
    o_ref: (Dout_pad, Tt)  output dtype
    """
    # MXU matmul with f32 accumulator; N (lane) dimension is the T tile.
    y = jnp.dot(w_ref[...], x_ref[...], preferred_element_type=jnp.float32)

    bias = p_ref[:, 0:1]
    gamma = p_ref[:, 1:2]
    beta = p_ref[:, 2:3]

    y = y + bias                                      # (Dout_pad, Tt)

    inv_n = 1.0 / n_valid
    # LayerNorm over the feature axis (= sublanes here), eps=1e-5, biased var.
    mu = jnp.sum(y, axis=0, keepdims=True) * inv_n    # (1, Tt)
    yc = y - mu
    # Two-pass (centered) variance; exclude zero-padded Dout rows if present.
    ycm = yc * p_ref[:, 3:4] if need_mask else yc
    var = jnp.sum(ycm * ycm, axis=0, keepdims=True) * inv_n
    scale = gamma * jax.lax.rsqrt(var + eps)          # gamma folded into scale
    out = yc * scale + beta
    o_ref[...] = jnp.maximum(out, 0.0).astype(o_ref.dtype)


def fc_ln_relu_channel_major(x_cm, w, b, gamma, beta, *,
                             max_t_tile=512, matmul_dtype=None):
    """Fused Linear+LayerNorm+ReLU on channel-major activations.

    x_cm:  [B, Din, Tp]   (channel-major activations; Tp = tokens)
    w:     [Dout, Din]    (torch nn.Linear weight layout)
    b, gamma, beta: [Dout]
    Returns [B, Dout, Tp] in x_cm.dtype — i.e. already in the module's
    output layout, no transpose needed.
    """
    B, din, Tp = x_cm.shape
    dout = w.shape[0]
    out_dtype = x_cm.dtype

    mm_dtype = jnp.dtype(x_cm.dtype if matmul_dtype is None else matmul_dtype)
    sub = {4: 8, 2: 16, 1: 32}.get(mm_dtype.itemsize, 8)   # sublane packing
    dout_pad = _round_up(dout, sub)

    # T' (lane) tiling: full extent when small, else multiples of 128.
    if Tp <= max_t_tile:
        t_tile, tp_pad = Tp, Tp
    else:
        t_tile = max(128, (max_t_tile // 128) * 128)
        tp_pad = _round_up(Tp, t_tile)

    xk = x_cm
    if tp_pad != Tp:                       # rare ragged tail (sliced off below)
        xk = jnp.pad(xk, ((0, 0), (0, 0), (0, tp_pad - Tp)))
    wk = w
    if dout_pad != dout:                   # zero rows -> contribute 0 to LN sums
        wk = jnp.pad(wk, ((0, dout_pad - dout), (0, 0)))
    if matmul_dtype is not None:
        xk = xk.astype(matmul_dtype)       # cast once outside the kernel
        wk = wk.astype(matmul_dtype)

    # Merge bias/gamma/beta + row-validity mask into one small f32 operand.
    mask = (jnp.arange(dout_pad) < dout).astype(jnp.float32)
    pad1 = lambda v: jnp.pad(v.astype(jnp.float32), (0, dout_pad - dout))
    p_fused = jnp.stack([pad1(b), pad1(gamma), pad1(beta), mask], axis=1)

    num_t = tp_pad // t_tile
    grid = (B, num_t)

    kern = functools.partial(_fc_ln_relu_cm_kernel,
                             n_valid=float(dout), eps=1e-5,
                             need_mask=(dout_pad != dout))

    cost = pl.CostEstimate(
        flops=int(2 * B * tp_pad * din * dout_pad + 8 * B * tp_pad * dout_pad),
        transcendentals=int(B * tp_pad),
        bytes_accessed=int(xk.size * xk.dtype.itemsize
                           + B * tp_pad * dout_pad * jnp.dtype(out_dtype).itemsize
                           + wk.size * wk.dtype.itemsize
                           + p_fused.size * 4),
    )

    out = pl.pallas_call(
        kern,
        out_shape=jax.ShapeDtypeStruct((B, dout_pad, tp_pad), out_dtype),
        grid=grid,
        in_specs=[
            # activations: one batch element, one T tile per grid step
            pl.BlockSpec((None, din, t_tile), lambda bb, tt: (bb, 0, tt)),
            # weights / fused params: grid-constant blocks (fetched once)
            pl.BlockSpec((dout_pad, din), lambda bb, tt: (0, 0)),
            pl.BlockSpec((dout_pad, 4), lambda bb, tt: (0, 0)),
        ],
        out_specs=pl.BlockSpec((None, dout_pad, t_tile), lambda bb, tt: (bb, 0, tt)),
        compiler_params=pltpu.CompilerParams(
            dimension_semantics=("parallel", "parallel")),
        cost_estimate=cost,
    )(xk, wk, p_fused)

    return out[:, :dout, :Tp]


def reshape_features_forward(inps, params, *, max_t_tile=512, matmul_dtype=None):
    """inps = [s2, s3, s4] with shapes [B, C, T].  Returns [s4, s3_out, s2_out]."""
    assert isinstance(inps, (list, tuple)) and len(inps) == 3
    s2, s3, s4 = inps
    b2, c2, t2 = s2.shape
    b3, c3, t3 = s3.shape
    assert t2 % 4 == 0 and t3 % 2 == 0

    # Zero-copy row-major reshapes (same semantics as torch .reshape on a
    # contiguous tensor); activations stay channel-major end to end.
    x2 = s2.reshape(b2, c2 * 4, t2 // 4)
    x3 = s3.reshape(b3, c3 * 2, t3 // 2)

    y2 = fc_ln_relu_channel_major(x2, params["w2"], params["b2"],
                                  params["g2"], params["bt2"],
                                  max_t_tile=max_t_tile, matmul_dtype=matmul_dtype)
    y3 = fc_ln_relu_channel_major(x3, params["w3"], params["b3"],
                                  params["g3"], params["bt3"],
                                  max_t_tile=max_t_tile, matmul_dtype=matmul_dtype)
    return [s4, y3, y2]


def _ref_branch(x, factor, w, b, gamma, beta):
    """Pure-JAX reference mirroring the torch module (token-major path)."""
    B, C, T = x.shape
    xr = x.reshape(B, C * factor, T // factor)
    xt = jnp.transpose(xr, (0, 2, 1)).astype(jnp.float32)
    y = xt @ w.astype(jnp.float32).T + b
    mu = jnp.mean(y, axis=-1, keepdims=True)
    var = jnp.mean((y - mu) ** 2, axis=-1, keepdims=True)
    y = (y - mu) / jnp.sqrt(var + 1e-5) * gamma + beta
    y = jnp.maximum(y, 0.0)
    return jnp.transpose(y, (0, 2, 1))


if __name__ == "__main__":
    key = jax.random.PRNGKey(0)
    ks = jax.random.split(key, 16)

    # ---- small config consistent with the module -------------------------
    B, C2, C3, T = 2, 8, 16, 16
    in_channels = [4 * C2, 2 * C3]          # [32, 32]
    out_channels = 32

    s2 = jax.random.normal(ks[0], (B, C2, T), jnp.float32)
    s3 = jax.random.normal(ks[1], (B, C3, T), jnp.float32)
    s4 = jax.random.normal(ks[2], (B, 2 * C3, T // 2), jnp.float32)

    # Linear weights kept in torch layout (Dout, Din).
    params = {
        "w2": 0.1 * jax.random.normal(ks[3], (out_channels, in_channels[0]), jnp.float32),
        "b2": 0.1 * jax.random.normal(ks[4], (out_channels,), jnp.float32),
        "g2": 1.0 + 0.1 * jax.random.normal(ks[5], (out_channels,), jnp.float32),
        "bt2": 0.1 * jax.random.normal(ks[6], (out_channels,), jnp.float32),
        "w3": 0.1 * jax.random.normal(ks[7], (out_channels, in_channels[1]), jnp.float32),
        "b3": 0.1 * jax.random.normal(ks[8], (out_channels,), jnp.float32),
        "g3": 1.0 + 0.1 * jax.random.normal(ks[9], (out_channels,), jnp.float32),
        "bt3": 0.1 * jax.random.normal(ks[10], (out_channels,), jnp.float32),
    }

    outs = jax.block_until_ready(reshape_features_forward([s2, s3, s4], params))

    ref2 = _ref_branch(s2, 4, params["w2"], params["b2"], params["g2"], params["bt2"])
    ref3 = _ref_branch(s3, 2, params["w3"], params["b3"], params["g3"], params["bt3"])
    assert outs[0].shape == s4.shape and bool(jnp.allclose(outs[0], s4))
    assert outs[1].shape == (B, out_channels, T // 2)
    assert outs[2].shape == (B, out_channels, T // 4)
    assert bool(jnp.allclose(outs[1], ref3, atol=1e-5, rtol=1e-5))
    assert bool(jnp.allclose(outs[2], ref2, atol=1e-5, rtol=1e-5))

    # ---- bf16 matmul path (cast once outside, f32 accumulator / f32 LN) --
    outs_bf16 = jax.block_until_ready(
        reshape_features_forward([s2, s3, s4], params, matmul_dtype=jnp.bfloat16))
    assert bool(jnp.allclose(outs_bf16[1], ref3, atol=0.2, rtol=0.2))
    assert bool(jnp.allclose(outs_bf16[2], ref2, atol=0.2, rtol=0.2))

    # ---- larger config: exercises T' lane tiling (256-wide tiles), ragged
    # T' padding, and Dout padding + LayerNorm row mask (Dout=20 -> pad 24).
    Bb, C2b, C3b, Tb, doutb = 2, 32, 64, 1152, 20
    s2b = jax.random.normal(ks[11], (Bb, C2b, Tb), jnp.float32)
    s3b = jax.random.normal(ks[12], (Bb, C3b, Tb), jnp.float32)
    s4b = jax.random.normal(ks[13], (Bb, 2 * C3b, Tb // 2), jnp.float32)
    pb = {
        "w2": 0.1 * jax.random.normal(ks[14], (doutb, 4 * C2b), jnp.float32),
        "b2": 0.1 * jax.random.normal(ks[15], (doutb,), jnp.float32),
        "g2": 1.0 + 0.1 * jax.random.normal(ks[4], (doutb,), jnp.float32),
        "bt2": 0.1 * jax.random.normal(ks[5], (doutb,), jnp.float32),
        "w3": 0.1 * jax.random.normal(ks[6], (doutb, 2 * C3b), jnp.float32),
        "b3": 0.1 * jax.random.normal(ks[7], (doutb,), jnp.float32),
        "g3": 1.0 + 0.1 * jax.random.normal(ks[8], (doutb,), jnp.float32),
        "bt3": 0.1 * jax.random.normal(ks[9], (doutb,), jnp.float32),
    }
    outsb = jax.block_until_ready(
        reshape_features_forward([s2b, s3b, s4b], pb, max_t_tile=256))
    refb2 = _ref_branch(s2b, 4, pb["w2"], pb["b2"], pb["g2"], pb["bt2"])
    refb3 = _ref_branch(s3b, 2, pb["w3"], pb["b3"], pb["g3"], pb["bt3"])
    assert outsb[1].shape == (Bb, doutb, Tb // 2)
    assert outsb[2].shape == (Bb, doutb, Tb // 4)
    assert bool(jnp.allclose(outsb[1], refb3, atol=2e-3, rtol=2e-3))
    assert bool(jnp.allclose(outsb[2], refb2, atol=2e-3, rtol=2e-3))

    print("KERNEL_OK")
</pallas_src>

<mosaic_0001>
module attributes {stable_mosaic.version = 11 : i64} {
  func.func @_fc_ln_relu_cm_kernel(%arg0: i32, %arg1: i32, %arg2: memref<1x32x4xf32, #tpu.memory_space<vmem>>, %arg3: memref<32x32xf32, #tpu.memory_space<vmem>>, %arg4: memref<32x4xf32, #tpu.memory_space<vmem>>, %arg5: memref<1x32x4xf32, #tpu.memory_space<vmem>>) attributes {dimension_semantics = [#tpu.dimension_semantics<parallel>, #tpu.dimension_semantics<parallel>], iteration_bounds = array<i64: 2, 1>, scalar_prefetch = 0 : i64, scratch_operands = 0 : i64, tpu.core_type = #tpu.core_type<tc>, window_params = [{transform_indices = @transform_0, window_bounds = array<i64: 1, 32, 4>}, {pipeline_mode = #tpu.pipeline_mode<synchronous>, transform_indices = @transform_1, window_bounds = array<i64: 32, 32>}, {pipeline_mode = #tpu.pipeline_mode<synchronous>, transform_indices = @transform_2, window_bounds = array<i64: 32, 4>}, {transform_indices = @transform_3, window_bounds = array<i64: 1, 32, 4>}]} {
    %c0 = arith.constant 0 : index
    %c0_0 = arith.constant 0 : index
    %0 = vector.load %arg3[%c0, %c0_0] : memref<32x32xf32, #tpu.memory_space<vmem>>, vector<32x32xf32>
    %c0_1 = arith.constant 0 : index
    %c0_2 = arith.constant 0 : index
    %c0_3 = arith.constant 0 : index
    %1 = vector.load %arg2[%c0_1, %c0_2, %c0_3] : memref<1x32x4xf32, #tpu.memory_space<vmem>>, vector<1x32x4xf32>
    %2 = vector.shape_cast %1 : vector<1x32x4xf32> to vector<32x4xf32>
    %cst = arith.constant dense<0.000000e+00> : vector<32x4xf32>
    %3 = tpu.matmul %0, %2, %cst {dimension_numbers = #tpu.dot_dimension_numbers<[1], [0], [0], [1], [0, 0, 1, 1], [], []>} : vector<32x32xf32>, vector<32x4xf32>, vector<32x4xf32> -> vector<32x4xf32>
    %c0_4 = arith.constant 0 : index
    %c0_5 = arith.constant 0 : index
    %4 = vector.load %arg4[%c0_4, %c0_5] : memref<32x4xf32, #tpu.memory_space<vmem>>, vector<32x1xf32>
    %c0_6 = arith.constant 0 : index
    %c1 = arith.constant 1 : index
    %5 = vector.load %arg4[%c0_6, %c1] : memref<32x4xf32, #tpu.memory_space<vmem>>, vector<32x1xf32>
    %c0_7 = arith.constant 0 : index
    %c2 = arith.constant 2 : index
    %6 = vector.load %arg4[%c0_7, %c2] : memref<32x4xf32, #tpu.memory_space<vmem>>, vector<32x1xf32>
    %7 = vector.broadcast %4 : vector<32x1xf32> to vector<32x4xf32>
    %8 = arith.addf %3, %7 : vector<32x4xf32>
    %cst_8 = arith.constant dense<0.000000e+00> : vector<4xf32>
    %9 = vector.multi_reduction <add>, %8, %cst_8 [0] : vector<32x4xf32> to vector<4xf32>
    %10 = vector.shape_cast %9 : vector<4xf32> to vector<1x4xf32>
    %cst_9 = arith.constant 3.125000e-02 : f32
    %11 = vector.broadcast %cst_9 : f32 to vector<1x4xf32>
    %12 = arith.mulf %10, %11 : vector<1x4xf32>
    %13 = vector.broadcast %12 : vector<1x4xf32> to vector<32x4xf32>
    %14 = arith.subf %8, %13 : vector<32x4xf32>
    %15 = arith.mulf %14, %14 : vector<32x4xf32>
    %cst_10 = arith.constant dense<0.000000e+00> : vector<4xf32>
    %16 = vector.multi_reduction <add>, %15, %cst_10 [0] : vector<32x4xf32> to vector<4xf32>
    %17 = vector.shape_cast %16 : vector<4xf32> to vector<1x4xf32>
    %cst_11 = arith.constant 3.125000e-02 : f32
    %18 = vector.broadcast %cst_11 : f32 to vector<1x4xf32>
    %19 = arith.mulf %17, %18 : vector<1x4xf32>
    %cst_12 = arith.constant 9.99999974E-6 : f32
    %20 = vector.broadcast %cst_12 : f32 to vector<1x4xf32>
    %21 = arith.addf %19, %20 : vector<1x4xf32>
    %22 = math.rsqrt %21 : vector<1x4xf32>
    %23 = vector.broadcast %5 : vector<32x1xf32> to vector<32x4xf32>
    %24 = vector.broadcast %22 : vector<1x4xf32> to vector<32x4xf32>
    %25 = arith.mulf %23, %24 : vector<32x4xf32>
    %26 = arith.mulf %14, %25 : vector<32x4xf32>
    %27 = vector.broadcast %6 : vector<32x1xf32> to vector<32x4xf32>
    %28 = arith.addf %26, %27 : vector<32x4xf32>
    %cst_13 = arith.constant 0.000000e+00 : f32
    %29 = vector.broadcast %cst_13 : f32 to vector<32x4xf32>
    %30 = arith.maximumf %28, %29 : vector<32x4xf32>
    %c0_14 = arith.constant 0 : index
    %c0_15 = arith.constant 0 : index
    %c0_16 = arith.constant 0 : index
    %31 = vector.load %arg5[%c0_14, %c0_15, %c0_16] : memref<1x32x4xf32, #tpu.memory_space<vmem>>, vector<1x32x4xf32>
    %32 = vector.shape_cast %31 : vector<1x32x4xf32> to vector<32x4xf32>
    %33 = vector.shape_cast %30 : vector<32x4xf32> to vector<1x32x4xf32>
    tpu.vector_store %arg5[%c0_14, %c0_15, %c0_16], %33 {strides = array<i32>} : memref<1x32x4xf32, #tpu.memory_space<vmem>>, vector<1x32x4xf32>,
    return
  }
  func.func @transform_0(%arg0: i32, %arg1: i32) -> (i32, i32, i32) {
    %c0_i32 = arith.constant 0 : i32
    %c0_i32_0 = arith.constant 0 : i32
    return %arg0, %c0_i32, %arg1 : i32, i32, i32
  }
  func.func @transform_1(%arg0: i32, %arg1: i32) -> (i32, i32) {
    %c0_i32 = arith.constant 0 : i32
    %c0_i32_0 = arith.constant 0 : i32
    %c0_i32_1 = arith.constant 0 : i32
    return %c0_i32, %c0_i32_0 : i32, i32
  }
  func.func @transform_2(%arg0: i32, %arg1: i32) -> (i32, i32) {
    %c0_i32 = arith.constant 0 : i32
    %c0_i32_0 = arith.constant 0 : i32
    %c0_i32_1 = arith.constant 0 : i32
    return %c0_i32, %c0_i32_0 : i32, i32
  }
  func.func @transform_3(%arg0: i32, %arg1: i32) -> (i32, i32, i32) {
    %c0_i32 = arith.constant 0 : i32
    %c0_i32_0 = arith.constant 0 : i32
    return %arg0, %c0_i32, %arg1 : i32, i32, i32
  }
}

</mosaic_0001>

<bundles_post_ra>
// kernel: tpu_custom_call.1
= control target key start
LH: loop header
LB: loop body
LE: loop exit
PB: predicated region body
PF: predicated region fallthrough
CT: control target
= control target key end

     0   :  { %s635_s12 = smov 0   ;;  %s637_s13 = smov 0   ;;  %s715_s0 = inlined_call_operand.vmem [shape: f32[2,32,4], index: 0, kind: input, shape index: {}]   ;;  %s716_s1 = inlined_call_operand.vmem [shape: f32[32,32], index: 1, kind: input, shape index: {}]   ;;  %s717_s2 = inlined_call_operand.vmem [shape: f32[32,4], index: 2, kind: input, shape index: {}]   ;;  %s718_s3 = inlined_call_operand.vmem [shape: f32[2,32,4], index: 3, kind: output, shape index: {}]  }
   0x1   :  { %s639_s14 = smov 0  }
   0x2 LB: > { %s25_s15 = sadd.s32 1, %s606_s13  ;;  %p510_p0 = scmp.ge.s32.totalorder %s610_s14, 1  ;;  %s610_s14 = sphi %s639_s14, %s13_s14   ;;  %s606_s13 = sphi %s637_s13, %s720_s13   ;;  %s602_s12 = sphi %s635_s12, %s719_s12  }
   0x3   : > { %p27_p1 = scmp.ge.s32.totalorder %s25_s15, 2  ;;  %p156_p2 = scmp.lt.s32.totalorder %s610_s14, 3 }
   0x5   : > { %s722_s15 = smov (%p27_p1, %s25_s15), 0  ;;  %p157_p3 = pnand %p510_p0, %p156_p2 }
   0x6   : > { %p186_p4 = scmp.lt.s32.totalorder (!%p157_p3), %s602_s12, 1 }
   0x7   : > { %160 = sbr.rel (%p157_p3) target bundleno = 293 (0x125), region = 32 }
   0xc   : > { %v202_v0 = vld [vmem:[%s716_s1] sm:$0xff]  ;;  %vm234_vm0 = vcmask 261120   ;;  %v204_v1 = vld [vmem:[%s716_s1 + $0x10] sm:$0xff]  ;;  %s724_s12 = smov (!%p186_p4, %s602_s12), 1  ;;  %v612_v4 = vmov 0   ;;  %v203_v9 = vld [vmem:[%s716_s1 + $0x8] sm:$0xff] }
   0xd   : > { %539 = vmatprep.mubr.msk.f32.mxu0 %vm234_vm0, %v202_v0  ;;  %542 = vmatprep.mubr.msk.f32.mxu1 %vm234_vm0, %v204_v1  ;;  %v210_v2 = vld [vmem:[%s717_s2] sm:$0xff]  ;;  %v212_v3 = vld [vmem:[%s717_s2 + $0x10] sm:$0xff]  ;;  %s521_s24 = sshll.u32 %s724_s12, 5  ;;  %v205_v10 = vld [vmem:[%s716_s1 + $0x18] sm:$0xff]  ;;  %v613_v13 = vmov 1   ;;  %v614_v14 = vmov 2  }
   0xe   : > { %580 = vset.pattern.permute.xlu0 %v612_v4  ;;  %581 = vset.pattern.permute.xlu1 %v612_v4  ;;  %s193_s27 = scalar_lea.vmem %s715_s0, %s521_s24  ;;  %v211_v11 = vld [vmem:[%s717_s2 + $0x8] sm:$0xff]  ;;  %v213_v12 = vld [vmem:[%s717_s2 + $0x18] sm:$0xff]  ;;  %vm332_vm1 = vcmask 31744   ;;  %s201_s11 = scalar_lea.vmem %s718_s3, %s521_s24 }
   0xf   : > { %216 = vperm.xlu0 %580, %v210_v2   ;;  %226 = vperm.xlu1 %581, %v212_v3   ;;  %v209_v5 = vld [vmem:[%s193_s27 + $0x18] sm:$0xff]  ;;  %v208_v6 = vld [vmem:[%s193_s27 + $0x10] sm:$0xff]  ;;  %v207_v7 = vld [vmem:[%s193_s27 + $0x8] sm:$0xff] }
  0x10   : > { %531 = vmatprep.subr.mxu0 %v209_v5  ;;  %545 = vmatprep.subr.mxu1 %v209_v5  ;;  %v206_v8 = vld [vmem:[%s193_s27] sm:$0xff] }
  0x11   : > { %532 = vmatpush3.msra.mxu0 %v209_v5  ;;  %549 = vmatpush3.msra.mxu1 %v209_v5 }
  0x12   : > { %533 = vmatprep.subr.mxu0 %v208_v6  ;;  %546 = vmatprep.subr.mxu1 %v208_v6 }
  0x13   : > { %534 = vmatpush3.msra.mxu0 %v208_v6  ;;  %550 = vmatpush3.msra.mxu1 %v208_v6 }
  0x14   : > { %535 = vmatprep.subr.mxu0 %v207_v7  ;;  %547 = vmatprep.subr.mxu1 %v207_v7 }
  0x15   : > { %536 = vmatpush3.msra.mxu0 %v207_v7  ;;  %551 = vmatpush3.msra.mxu1 %v207_v7 }
  0x16   : > { %537 = vmatprep.subr.mxu0 %v206_v8  ;;  %548 = vmatprep.subr.mxu1 %v206_v8 }
  0x17   : > { %538 = vmatpush3.msra.mxu0 %v206_v8  ;;  %552 = vmatpush3.msra.mxu1 %v206_v8 }
  0x18   : > { %540 = vmatmul.mubr.msk.f32.vlgmr.msra.gmra.mxu0 %vm234_vm0, %v203_v9  ;;  %543 = vmatmul.mubr.msk.f32.vlgmr.msra.gmra.mxu1 %vm234_vm0, %v205_v10 }
  0x19   : > { %221 = vperm.xlu0 %580, %v211_v11   ;;  %231 = vperm.xlu1 %581, %v213_v12  }
  0x1d   : > { %583 = vset.pattern.permute.xlu1 %v613_v13  ;;  %582 = vset.pattern.permute.xlu0 %v613_v13 }
  0x1e   : > { %376 = vperm.xlu1 %583, %v211_v11   ;;  %372 = vperm.xlu0 %582, %v210_v2  }
  0x22   : > { %380 = vperm.xlu1 %583, %v212_v3   ;;  %384 = vperm.xlu0 %582, %v213_v12  }
  0x26   : > { %584 = vset.pattern.permute.xlu1 %v614_v14  ;;  %585 = vset.pattern.permute.xlu0 %v614_v14 }
  0x27   : > { %396 = vperm.xlu1 %584, %v210_v2   ;;  %400 = vperm.xlu0 %585, %v211_v11  }
  0x2b   : > { %404 = vperm.xlu1 %584, %v212_v3  }
  0x2f   : > { %408 = vperm.xlu1 %584, %v213_v12  }
  0x8a   : > { %v217_v15 = vpop.permute.xlu0 %216  ;;  %v227_v16 = vpop.permute.xlu1 %226 }
  0x94   : > { %v222_v17 = vpop.permute.xlu0 %221  ;;  %v232_v21 = vpop.permute.xlu1 %231 }
  0x99   : > { %v377_v61 = vpop.permute.xlu1 %376  ;;  %v373_v3 = vpop.permute.xlu0 %372 }
  0x9d   : > { %v381_v1 = vpop.permute.xlu1 %380  ;;  %v385_v5 = vpop.permute.xlu0 %384 }
  0xa2   : > { %v397_v2 = vpop.permute.xlu1 %396  ;;  %v401_v11 = vpop.permute.xlu0 %400 }
  0xa6   : > { %v405_v4 = vpop.permute.xlu1 %404 }
  0xd8   : > { %v541_v18 = vpop.f32.mrf.mxu0  ;;  %v544_v19 = vpop.f32.mrf.mxu1 }
  0xd9   : > { %v319_v20 = vadd.f32 %v541_v18, %v222_v17  ;;  %v329_v27 = vadd.f32 %v544_v19, %v232_v21 }
  0xda   : > { %v313_v22 = vpop.f32.mrf.mxu0  ;;  %v323_v23 = vpop.f32.mrf.mxu1 }
  0xdb   : > { %v314_v24 = vadd.f32 %v313_v22, %v217_v15  ;;  %v324_v25 = vadd.f32 %v323_v23, %v227_v16  ;;  %v334_v26 = vsel %vm332_vm1, %v319_v20, 0.0  ;;  %v338_v32 = vsel %vm332_vm1, %v329_v27, 0.0  ;;  %v409_v16 = vpop.permute.xlu1 %408 }
  0xdd   : > { %v333_v28 = vsel %vm332_vm1, %v314_v24, 0.0  ;;  %v336_v30 = vsel %vm332_vm1, %v324_v25, 0.0 }
  0xde   : > { %v335_v29 = vadd.f32 %v334_v26, %v333_v28 }
  0xe0   : > { %v337_v31 = vadd.f32 %v336_v30, %v335_v29 }
  0xe2   : > { %v339_v33 = vadd.f32 %v338_v32, %v337_v31 }
  0xe4   : > { %v340_v34 = vrot.slane %v339_v33, 4 }
  0xe6   : > { %v341_v35 = vadd.f32 %v340_v34, %v339_v33 }
  0xe8   : > { %v342_v36 = vrot.slane %v341_v35, 2 }
  0xea   : > { %v343_v37 = vadd.f32 %v342_v36, %v341_v35 }
  0xec   : > { %v344_v38 = vrot.slane %v343_v37, 1 }
  0xee   : > { %v345_v39 = vadd.f32 %v344_v38, %v343_v37 }
  0xf0   : > { %v346_v40 = vmul.f32 0.03125, %v345_v39 }
  0xf2   : > { %v347_v41 = vsub.f32 %v314_v24, %v346_v40  ;;  %v348_v42 = vsub.f32 %v319_v20, %v346_v40  ;;  %v349_v43 = vsub.f32 %v324_v25, %v346_v40  ;;  %v350_v44 = vsub.f32 %v329_v27, %v346_v40 }
  0xf4   : > { %v351_v45 = vmul.f32 %v347_v41, %v347_v41  ;;  %v352_v46 = vmul.f32 %v348_v42, %v348_v42  ;;  %v353_v47 = vmul.f32 %v349_v43, %v349_v43  ;;  %v354_v48 = vmul.f32 %v350_v44, %v350_v44 }
  0xf6   : > { %v355_v49 = vsel %vm332_vm1, %v351_v45, 0.0  ;;  %v356_v50 = vsel %vm332_vm1, %v352_v46, 0.0  ;;  %v358_v52 = vsel %vm332_vm1, %v353_v47, 0.0  ;;  %v360_v54 = vsel %vm332_vm1, %v354_v48, 0.0 }
  0xf7   : > { %v357_v51 = vadd.f32 %v356_v50, %v355_v49 }
  0xf9   : > { %v359_v53 = vadd.f32 %v358_v52, %v357_v51 }
  0xfb   : > { %v361_v55 = vadd.f32 %v360_v54, %v359_v53 }
  0xfd   : > { %v362_v56 = vrot.slane %v361_v55, 4 }
  0xff   : > { %v363_v57 = vadd.f32 %v362_v56, %v361_v55 }
 0x101   : > { %v364_v58 = vrot.slane %v363_v57, 2 }
 0x103   : > { %v365_v59 = vadd.f32 %v364_v58, %v363_v57 }
 0x105   : > { %v366_v60 = vrot.slane %v365_v59, 1 }
 0x107   : > { %v367_v62 = vadd.f32 %v366_v60, %v365_v59 }
 0x109   : > { %v368_v63 = vmul.f32 0.03125, %v367_v62 }
 0x10b   : > { %v369_v0 = vadd.f32 1e-05, %v368_v63 }
 0x10d   : > { %586 = vrsqrt.f32 %v369_v0 }
 0x11a   : > { %v587_v6 = vpop.eup %586 }
 0x11b   : > { %v388_v7 = vmul.f32 %v587_v6, %v377_v61  ;;  %v389_v8 = vmul.f32 %v587_v6, %v381_v1  ;;  %v387_v9 = vmul.f32 %v587_v6, %v373_v3  ;;  %v390_v10 = vmul.f32 %v587_v6, %v385_v5 }
 0x11d   : > { %v391_v12 = vmul.f32 %v387_v9, %v347_v41  ;;  %v393_v13 = vmul.f32 %v389_v8, %v349_v43  ;;  %v394_v14 = vmul.f32 %v390_v10, %v350_v44  ;;  %v392_v15 = vmul.f32 %v388_v7, %v348_v42 }
 0x11f   : > { %v411_v17 = vadd.f32 %v397_v2, %v391_v12  ;;  %v413_v18 = vadd.f32 %v405_v4, %v393_v13  ;;  %v414_v19 = vadd.f32 %v409_v16, %v394_v14  ;;  %v412_v20 = vadd.f32 %v401_v11, %v392_v15 }
 0x121   : > { %v415_v21 = vmax.f32 %v411_v17, 0.0  ;;  %v417_v22 = vmax.f32 %v413_v18, 0.0  ;;  %v418_v23 = vmax.f32 %v414_v19, 0.0  ;;  %v416_v24 = vmax.f32 %v412_v20, 0.0 }
 0x123   : > { %419 = vst.msk [vmem:[%s201_s11] sm:$0xff] %vm332_vm1, %v415_v21  ;;  %421 = vst.msk [vmem:[%s201_s11 + $0x10] sm:$0xff] %vm332_vm1, %v417_v22 }
 0x124   : > { %422 = vst.msk [vmem:[%s201_s11 + $0x18] sm:$0xff] %vm332_vm1, %v418_v23  ;;  %420 = vst.msk [vmem:[%s201_s11 + $0x8] sm:$0xff] %vm332_vm1, %v416_v24 }
 0x125 PF: > { %s13_s14 = sadd.s32 1, %s610_s14   ;;  %s719_s12 = smov %s606_s13 }
 0x126   : > { %p10_p5 = scmp.ge.s32.totalorder %s13_s14, 4   ;;  %s720_s13 = smov %s722_s15 }
 0x128   :  { %12 = sbr.rel (!%p10_p5) target bundleno = 2 (0x2), region = 62 }

</bundles_post_ra>
